<compile_context>
chip_gen: v7x
topology: tpu7x:2x2x1
jax: 0.10.0
libtpu: 0.0.40
codegen_flags: <defaults>
</compile_context>

<pallas_src>
import jax
import jax.numpy as jnp
from jax.experimental import pallas as pl
from jax.experimental.pallas import tpu as pltpu


_TARGET_STEP_BYTES = 2 * 1024 * 1024    # aim for >= ~2 MiB of x+out DMA per grid step
_BLOCK_BUDGET = 24 * 1024 * 1024        # double-buffered x+out blocks stay under this
_VMEM_CAP = 48 * 1024 * 1024            # never request more than this (v7x phys = 64 MiB)
_MAX_LANE_TILE = 8192
_MAX_BATCH_FOLD = 32


def _cdiv(a, b):
    return (a + b - 1) // b


# ----------------------------- Pallas kernels ---------------------------------

def _out_conv_mxu_kernel(x_ref, w_ref, b_ref, o_ref):
    """out[i] = W @ x[i] + b on the MXU.
    x:(NB,Cin,T)  w:(Cout,Cin)  b:(Cout,1) f32  o:(NB,Cout,T)."""
    nb = x_ref.shape[0]
    t = x_ref.shape[2]
    cout = w_ref.shape[0]
    w = w_ref[...]
    bias = jnp.broadcast_to(b_ref[...], (cout, t))   # hoisted: one lane-broadcast per step
    for i in range(nb):                              # static unroll over the batch fold
        acc = jnp.dot(w, x_ref[i].astype(w.dtype),
                      preferred_element_type=jnp.float32)
        o_ref[i] = (acc + bias).astype(o_ref.dtype)


def _out_conv_vpu_kernel(x_ref, w_ref, b_ref, o_ref):
    """Tiny case (Cin <= 8, Cout == 1): unrolled scalar*vector multiply-adds in f32.
    x:(NB,Cin,T) VMEM   w:(Cin,) SMEM f32   b:(1,) SMEM f32   o:(NB,1,T)."""
    nb, cin, _ = x_ref.shape
    bias = b_ref[0]                                   # scalar from SMEM
    for i in range(nb):                               # static unroll over the batch fold
        x = x_ref[i].astype(jnp.float32)              # (Cin, T): single cast, f32 math
        acc = x[0:1, :] * w_ref[0]                    # scalar operands straight from SMEM
        for c in range(1, cin):
            acc = acc + x[c:c + 1, :] * w_ref[c]
        o_ref[i] = (acc + bias).astype(o_ref.dtype)


# ------------------------------- tiling / wrapper ------------------------------

def _choose_tiles(n, cin, cout, hw, x_itemsize, out_itemsize):
    bytes_per_px = cin * x_itemsize + cout * out_itemsize   # x + out bytes per pixel/image

    # Lane tile T: multiple of 128 (or the full extent), capped so a double-buffered
    # NB=1 block fits the budget, and capped at _MAX_LANE_TILE.
    t_budget = max(128, (_BLOCK_BUDGET // (2 * bytes_per_px)) // 128 * 128)
    t_cap = min(_MAX_LANE_TILE, t_budget)
    if hw <= t_cap:
        t = hw                                  # full-extent block is always legal
    else:
        t = t_cap
        if hw % 128 == 0:
            cand = t_cap                        # prefer an exact divisor near the cap
            while cand >= max(128, t_cap // 2):
                if hw % cand == 0:
                    t = cand
                    break
                cand -= 128

    # Batch fold NB: big enough per-step DMAs, within the VMEM block budget.
    step_bytes = bytes_per_px * t
    nb = max(1, _TARGET_STEP_BYTES // step_bytes)
    nb = min(nb, n, _MAX_BATCH_FOLD, max(1, _BLOCK_BUDGET // (2 * step_bytes)))

    # Keep >= 2 grid steps when possible (v7x has 2 TensorCores; also enables
    # prefetch/compute overlap): shrink NB first, then split the lane tile once.
    while nb > 1 and _cdiv(n, nb) * _cdiv(hw, t) < 2:
        nb //= 2
    if _cdiv(n, nb) * _cdiv(hw, t) < 2 and hw > 128:
        t = max(128, _cdiv(t // 2, 128) * 128)  # multiple of 128 -> ragged tail is masked
    return nb, t


def out_conv(x, w, b, *, out_dtype=None):
    """OutConv forward: y = Conv2d(Cin, Cout, kernel_size=1)(x), NCHW in / NCHW out.

    x : (N, Cin, H, W), float32 or bfloat16
    w : (Cout, Cin) or (Cout, Cin, 1, 1).  Pass bf16 weights (cast once at parameter
        build time) to get the bf16 MXU path.  The tiny path (Cin<=8, Cout==1) always
        computes in f32 (weights upcast), i.e. its numerics follow f32.
    b : (Cout,)
    out_dtype : optional output dtype (e.g. jnp.bfloat16 to halve write traffic);
        defaults to x.dtype.
    """
    n, cin, h, wd = x.shape
    if w.ndim == 4:
        w = w.reshape(w.shape[0], w.shape[1])
    cout, cin_w = w.shape
    assert cin_w == cin
    out_dtype = x.dtype if out_dtype is None else out_dtype

    hw = h * wd
    xr = x.reshape(n, cin, hw)                       # contiguous -> free, stays NCHW
    nb, t = _choose_tiles(n, cin, cout, hw,
                          x.dtype.itemsize, jnp.dtype(out_dtype).itemsize)
    grid = (_cdiv(n, nb), _cdiv(hw, t))

    use_vpu = (cin <= 8) and (cout == 1)

    x_spec = pl.BlockSpec((nb, cin, t), lambda bi, ti: (bi, 0, ti))
    o_spec = pl.BlockSpec((nb, cout, t), lambda bi, ti: (bi, 0, ti))

    if use_vpu:
        kernel = _out_conv_vpu_kernel
        w_arg = w.reshape(cin).astype(jnp.float32)
        b_arg = jnp.asarray(b, jnp.float32).reshape(1)
        w_spec = pl.BlockSpec(memory_space=pltpu.MemorySpace.SMEM)
        b_spec = pl.BlockSpec(memory_space=pltpu.MemorySpace.SMEM)
        wb_vmem = 0
    else:
        kernel = _out_conv_mxu_kernel
        w_arg = w
        b_arg = jnp.asarray(b, jnp.float32).reshape(cout, 1)
        w_spec = pl.BlockSpec((cout, cin), lambda bi, ti: (0, 0))
        b_spec = pl.BlockSpec((cout, 1), lambda bi, ti: (0, 0))
        wb_vmem = 2 * (cout * cin * w.dtype.itemsize + cout * 4)

    blk_bytes = (2 * nb * t * (cin * x.dtype.itemsize
                               + cout * jnp.dtype(out_dtype).itemsize)
                 + wb_vmem)
    vmem_limit = int(min(_VMEM_CAP, max(16 * 1024 * 1024, 2 * blk_bytes)))

    out = pl.pallas_call(
        kernel,
        out_shape=jax.ShapeDtypeStruct((n, cout, hw), out_dtype),
        grid=grid,
        in_specs=[x_spec, w_spec, b_spec],
        out_specs=o_spec,
        compiler_params=pltpu.CompilerParams(
            dimension_semantics=("parallel", "parallel"),
            vmem_limit_bytes=vmem_limit,
        ),
    )(xr, w_arg, b_arg)
    return out.reshape(n, cout, h, wd)


# ---------------------------------- main ----------------------------------------

if __name__ == "__main__":
    key = jax.random.PRNGKey(0)

    def make_params(k, cin, cout):
        kw, kb = jax.random.split(k)
        bound = 1.0 / (cin ** 0.5)                   # PyTorch Conv2d default init range
        wp = jax.random.uniform(kw, (cout, cin), jnp.float32, -bound, bound)
        bp = jax.random.uniform(kb, (cout,), jnp.float32, -bound, bound)
        return wp, bp

    k1, k2, k3, k4 = jax.random.split(key, 4)

    # Case 1: OutConv(4, 1) -> tiny-Cin VPU path (f32 weights, f32 math).
    x1 = jax.random.normal(k1, (2, 4, 16, 16), jnp.float32)
    w1, b1 = make_params(k2, 4, 1)
    y1 = jax.block_until_ready(jax.jit(out_conv)(x1, w1, b1))
    assert y1.shape == (2, 1, 16, 16)
    ref1 = jnp.einsum("nchw,oc->nohw", x1, w1,
                      precision=jax.lax.Precision.HIGHEST) + b1.reshape(1, 1, 1, 1)
    err1 = float(jnp.max(jnp.abs(y1 - ref1)))
    assert err1 < 1e-4, f"VPU path max abs err {err1}"

    # Case 2: OutConv(64, 16) -> bf16 MXU path (weights cast once at build time).
    x2 = jax.random.normal(k3, (2, 64, 16, 16), jnp.float32)
    w2, b2 = make_params(k4, 64, 16)
    w2_bf16 = w2.astype(jnp.bfloat16)
    y2 = jax.block_until_ready(jax.jit(out_conv)(x2, w2_bf16, b2))
    assert y2.shape == (2, 16, 16, 16)
    xq = x2.astype(jnp.bfloat16).astype(jnp.float32)
    wq = w2_bf16.astype(jnp.float32)
    ref2 = jnp.einsum("nchw,oc->nohw", xq, wq,
                      precision=jax.lax.Precision.HIGHEST) + b2.reshape(1, 16, 1, 1)
    err2 = float(jnp.max(jnp.abs(y2 - ref2)))
    assert err2 < 2e-3, f"MXU path max abs err {err2}"

    assert bool(jnp.isfinite(y1).all()) and bool(jnp.isfinite(y2).all())
    print("KERNEL_OK")
</pallas_src>

<mosaic_0001>
module attributes {stable_mosaic.version = 11 : i64} {
  func.func @_out_conv_vpu_kernel(%arg0: i32, %arg1: i32, %arg2: memref<1x4x256xf32, #tpu.memory_space<vmem>>, %arg3: memref<4xf32, #tpu.memory_space<smem>>, %arg4: memref<1xf32, #tpu.memory_space<smem>>, %arg5: memref<1x1x256xf32, #tpu.memory_space<vmem>>) attributes {dimension_semantics = [#tpu.dimension_semantics<parallel>, #tpu.dimension_semantics<parallel>], iteration_bounds = array<i64: 2, 1>, scalar_prefetch = 0 : i64, scratch_operands = 0 : i64, tpu.core_type = #tpu.core_type<tc>, window_params = [{transform_indices = @transform_0, window_bounds = array<i64: 1, 4, 256>}, {transform_indices = @transform_1, window_bounds = array<i64: 4>}, {transform_indices = @transform_2, window_bounds = array<i64: 1>}, {transform_indices = @transform_3, window_bounds = array<i64: 1, 1, 256>}]} {
    %c0 = arith.constant 0 : index
    %0 = memref.load %arg4[%c0] : memref<1xf32, #tpu.memory_space<smem>>
    %c0_0 = arith.constant 0 : index
    %c0_1 = arith.constant 0 : index
    %c0_2 = arith.constant 0 : index
    %1 = vector.load %arg2[%c0_0, %c0_1, %c0_2] : memref<1x4x256xf32, #tpu.memory_space<vmem>>, vector<1x4x256xf32>
    %2 = vector.shape_cast %1 : vector<1x4x256xf32> to vector<4x256xf32>
    %3 = vector.extract_strided_slice %2 {offsets = [0, 0], sizes = [1, 256], strides = [1, 1]} : vector<4x256xf32> to vector<1x256xf32>
    %c0_3 = arith.constant 0 : index
    %4 = memref.load %arg3[%c0_3] : memref<4xf32, #tpu.memory_space<smem>>
    %5 = vector.broadcast %4 : f32 to vector<1x256xf32>
    %6 = arith.mulf %3, %5 : vector<1x256xf32>
    %7 = vector.extract_strided_slice %2 {offsets = [1, 0], sizes = [1, 256], strides = [1, 1]} : vector<4x256xf32> to vector<1x256xf32>
    %c1 = arith.constant 1 : index
    %8 = memref.load %arg3[%c1] : memref<4xf32, #tpu.memory_space<smem>>
    %9 = vector.broadcast %8 : f32 to vector<1x256xf32>
    %10 = arith.mulf %7, %9 : vector<1x256xf32>
    %11 = arith.addf %6, %10 : vector<1x256xf32>
    %12 = vector.extract_strided_slice %2 {offsets = [2, 0], sizes = [1, 256], strides = [1, 1]} : vector<4x256xf32> to vector<1x256xf32>
    %c2 = arith.constant 2 : index
    %13 = memref.load %arg3[%c2] : memref<4xf32, #tpu.memory_space<smem>>
    %14 = vector.broadcast %13 : f32 to vector<1x256xf32>
    %15 = arith.mulf %12, %14 : vector<1x256xf32>
    %16 = arith.addf %11, %15 : vector<1x256xf32>
    %17 = vector.extract_strided_slice %2 {offsets = [3, 0], sizes = [1, 256], strides = [1, 1]} : vector<4x256xf32> to vector<1x256xf32>
    %c3 = arith.constant 3 : index
    %18 = memref.load %arg3[%c3] : memref<4xf32, #tpu.memory_space<smem>>
    %19 = vector.broadcast %18 : f32 to vector<1x256xf32>
    %20 = arith.mulf %17, %19 : vector<1x256xf32>
    %21 = arith.addf %16, %20 : vector<1x256xf32>
    %22 = vector.broadcast %0 : f32 to vector<1x256xf32>
    %23 = arith.addf %21, %22 : vector<1x256xf32>
    %c0_4 = arith.constant 0 : index
    %c0_5 = arith.constant 0 : index
    %c0_6 = arith.constant 0 : index
    %24 = vector.load %arg5[%c0_4, %c0_5, %c0_6] : memref<1x1x256xf32, #tpu.memory_space<vmem>>, vector<1x1x256xf32>
    %25 = vector.shape_cast %24 : vector<1x1x256xf32> to vector<1x256xf32>
    %26 = vector.shape_cast %23 : vector<1x256xf32> to vector<1x1x256xf32>
    tpu.vector_store %arg5[%c0_4, %c0_5, %c0_6], %26 {strides = array<i32>} : memref<1x1x256xf32, #tpu.memory_space<vmem>>, vector<1x1x256xf32>,
    return
  }
  func.func @transform_0(%arg0: i32, %arg1: i32) -> (i32, i32, i32) {
    %c0_i32 = arith.constant 0 : i32
    %c0_i32_0 = arith.constant 0 : i32
    return %arg0, %c0_i32, %arg1 : i32, i32, i32
  }
  func.func @transform_1(%arg0: i32, %arg1: i32) -> i32 {
    %c0_i32 = arith.constant 0 : i32
    %c0_i32_0 = arith.constant 0 : i32
    return %c0_i32 : i32
  }
  func.func @transform_2(%arg0: i32, %arg1: i32) -> i32 {
    %c0_i32 = arith.constant 0 : i32
    %c0_i32_0 = arith.constant 0 : i32
    return %c0_i32 : i32
  }
  func.func @transform_3(%arg0: i32, %arg1: i32) -> (i32, i32, i32) {
    %c0_i32 = arith.constant 0 : i32
    %c0_i32_0 = arith.constant 0 : i32
    return %arg0, %c0_i32, %arg1 : i32, i32, i32
  }
}

</mosaic_0001>

<bundles_post_ra>
// kernel: out_conv.1
= control target key start
LH: loop header
LB: loop body
LE: loop exit
PB: predicated region body
PF: predicated region fallthrough
CT: control target
= control target key end

     0   :  { %s554_s0 = inlined_call_operand.vmem [shape: f32[2,4,256], index: 0, kind: input, shape index: {}]   ;;  %s555_s1 = inlined_call_operand.vmem [shape: f32[4], index: 1, kind: input, shape index: {}]   ;;  %s556_s2 = inlined_call_operand.<no memory space> [shape: f32[1], index: 2, kind: input, shape index: {}]   ;;  %s557_s3 = inlined_call_operand.vmem [shape: f32[2,1,256], index: 3, kind: output, shape index: {}]  }
   0x1   :  { %8 = sst [smem:[#allocation2]] %s556_s2 }
   0x2   :  { %9 = vsyncpa [#allocation4], 0  ;;  %s491_s14 = smov 0   ;;  %s493_s15 = smov 0  }
   0x3   :  { %s495_s16 = smov 0  }
   0x4 LB: > { %s368_s2 = sadd.s32 4294967295, %s464_s16   ;;  %s27_s17 = sadd.s32 1, %s460_s15  ;;  %s464_s16 = sphi %s495_s16, %s15_s16   ;;  %s460_s15 = sphi %s493_s15, %s561_s15   ;;  %s456_s14 = sphi %s491_s14, %s560_s14  }
   0x5   : > { %p29_p0 = scmp.ge.s32.totalorder %s27_s17, 2  ;;  %p370_p1 = scmp.ge.s32.totalorder %s464_s16, 1 }
   0x6   : > { %p130_p2 = scmp.lt.s32.totalorder %s464_s16, 3  ;;  %p516_p4 = scmp.eq.s32.totalorder %s368_s2, 0 }
   0x7   : > { %s563_s17 = smov (%p29_p0, %s27_s17), 0  ;;  %s143_s22 = sshll.u32 %s555_s1, 4  ;;  %s144_s22 = int_to_ptr.vmem [resolvable:$true] %s143_s22 }
   0x8   : > { %p512_p3 = pnand %p370_p1, %p130_p2  ;;  %s423_s23 = scalar_lea.vmem %s144_s22, 16 }
   0x9   : > { %p424_p7 = scmp.ne.s32.totalorder %s144_s22, %s423_s23  ;;  %p431_p11 = scmp.lt.s32.totalorder %s144_s22, %s144_s22 }
   0xa   : > { %p391_p5 = pneg %p512_p3  ;;  %p432_p12 = scmp.lt.s32.totalorder %s423_s23, %s423_s23 }
   0xc   : > { %p392_p6 = pnand %p516_p4, %p391_p5  ;;  %p433_p13 = por %p432_p12, %p431_p11 }
   0xe   : > { %p425_p8 = pneg %p392_p6 }
  0x10   : > { %p426_p9 = pnand %p425_p8, %p424_p7 }
  0x12   : > { %p427_p10 = pneg %p426_p9 }
  0x14   : > { %p434_p0 = pnand %p433_p13, %p427_p10 }
  0x16   : > { %437 = shalt.err (!%p434_p0)
}
  0x17   : > { %s466_s24 = smov [#allocation3]   ;;  %172 = sbr.rel (%p512_p3) target bundleno = 58 (0x3a), region = 32 }
  0x18   : > { %394 = dma.vmem_to_smem (!%p392_p6), %s144_s22, 16, %s466_s24, [#allocation4]  }
  0x1e   : > { %451 = dma.done.wait (%p516_p4), [#allocation4], 16  }
  0x1f   : > { %453 = vsyncadd (%p516_p4), [#allocation4], 4294967280 }
  0x20   : > { %178 = sfence }
  0x21   : > { %p205_p1 = scmp.lt.s32.totalorder %s456_s14, 1  ;;  %s225_s25 = sld [smem:[#allocation3]]  ;;  %v258_v3 = vlaneseq  ;;  %v467_v6 = vmov 1966171168  }
  0x22   : > { %s378_s26 = sld [smem:[#allocation3 + $0x1]]  ;;  %s380_s27 = sld [smem:[#allocation3 + $0x2]]  ;;  %v256_v7 = vunpack.c.l.s4 %v467_v6 }
  0x23   : > { %s565_s14 = smov (!%p205_p1, %s456_s14), 1  ;;  %s382_s28 = sld [smem:[#allocation3 + $0x3]]  ;;  %v259_v13 = vshrl.u32 %v258_v3, 7  ;;  %vm272_vm0 = vcmp.lt.s32.totalorder %v258_v3, 256 }
  0x24   : > { %s386_s29 = sshll.u32 %s565_s14, 3  ;;  %s223_s6 = sld [smem:[#allocation2]]  ;;  %v257_v17 = vunpack.c.0.s8 %v256_v7 }
  0x25   : > { %s212_s5 = scalar_lea.vmem %s554_s0, %s386_s29  ;;  %s377_s7 = sshll.u32 %s565_s14, 1 }
  0x26   : > { %v224_v0 = vld [vmem:[%s212_s5] sm:$0xff]  ;;  %v260_v21 = vsub.s32 %v257_v17, %v259_v13  ;;  %s221_s10 = scalar_lea.vmem %s557_s3, %s377_s7 }
  0x27   : > { %v226_v1 = vstv %s225_s25 }
  0x28   : > { %v229_v2 = vstv %s378_s26  ;;  %v227_v4 = vmul.f32 %v226_v1, %v224_v0  ;;  %v237_v8 = vstv %s380_s27 }
  0x29   : > { %v230_v5 = vmul.f32 %v229_v2, %v224_v0  ;;  %v245_v9 = vstv %s382_s28  ;;  %v238_v11 = vmul.f32 %v237_v8, %v224_v0 }
  0x2a   : > { %v246_v12 = vmul.f32 %v245_v9, %v224_v0  ;;  %v252_v19 = vstv %s223_s6 }
  0x2b   : > { %v379_v10 = vrot.slane %v230_v5, 9  ;;  %v381_v15 = vrot.slane %v238_v11, 10 }
  0x2c   : > { %v383_v16 = vrot.slane %v246_v12, 11 }
  0x2d   : > { %v235_v14 = vadd.f32 %v379_v10, %v227_v4 }
  0x2f   : > { %v243_v18 = vadd.f32 %v381_v15, %v235_v14 }
  0x31   : > { %v251_v20 = vadd.f32 %v383_v16, %v243_v18 }
  0x33   : > { %v253_v22 = vadd.f32 %v252_v19, %v251_v20 }
  0x35   : > { %v261_v23 = vrot.slane %v253_v22, %v260_v21 }
  0x37   : > { %v268_v24 = vrot.slane %v261_v23, %v260_v21 }
  0x39   : > { %274 = vst.msk [vmem:[%s221_s10] sm:$0x3] %vm272_vm0, %v268_v24 }
  0x3a PF: > { %s15_s16 = sadd.s32 1, %s464_s16   ;;  %s560_s14 = smov %s460_s15 }
  0x3b   : > { %p12_p2 = scmp.ge.s32.totalorder %s15_s16, 4   ;;  %s561_s15 = smov %s563_s17 }
  0x3d   :  { %14 = sbr.rel (!%p12_p2) target bundleno = 4 (0x4), region = 67 }
  0x44   :  { %303 = vsyncpa [#allocation4], 1 }
  0x45   :  { %305 = vsyncpa [#allocation4 + $0x1], 1 }

</bundles_post_ra>
